<compile_context>
chip_gen: v7x
topology: tpu7x:2x2x1
jax: 0.10.0
libtpu: 0.0.40
codegen_flags: <defaults>
</compile_context>

<pallas_src>
import functools
from typing import Dict, List, Tuple

import jax
import jax.numpy as jnp
import numpy as np
from jax.experimental import pallas as pl
from jax.experimental.pallas import tpu as pltpu


def _round_up(x: int, m: int) -> int:
    return ((x + m - 1) // m) * m


def _cdiv(a: int, b: int) -> int:
    return -(-a // b)


# ----------------------------------------------------------------------------
# Fused Pallas kernel (transposed layout: batch rows live on the lane axis)
# ----------------------------------------------------------------------------

def _fused_hypernet_kernel(n_rows: int, tile_n: int, has_padding: bool,
                           n_inner: int, n_outer: int, *refs):
    """One kernel for the whole HyperNetwork forward.

    refs layout:
      xT_ref                              (input_size, tile_n) block
      [inner w (out,in), inner b (out,1)] * n_inner
      [outer w (h,h),   outer b (h,1)]    * n_outer
      pred_w_ref (P_pad, h_last), pred_b_ref (P_pad, 1)
      out_ref    (P_pad, 1)
      acc_ref    VMEM scratch (h_last, 1)  — running row-sum (column form)
    """
    x_ref = refs[0]
    idx = 1
    inner_refs = refs[idx: idx + 2 * n_inner]; idx += 2 * n_inner
    outer_refs = refs[idx: idx + 2 * n_outer]; idx += 2 * n_outer
    pw_ref = refs[idx]
    pb_ref = refs[idx + 1]
    out_ref = refs[idx + 2]
    acc_ref = refs[idx + 3]

    i = pl.program_id(0)
    last = pl.num_programs(0) - 1

    @pl.when(i == 0)
    def _init():
        acc_ref[...] = jnp.zeros_like(acc_ref)

    # Inner net on this (transposed) tile: (Linear -> ReLU) x n_inner.
    # Activations are (h, tile_n): fully lane-dense.
    h = x_ref[...]                                            # (in, tile_n)
    for layer in range(n_inner):
        w = inner_refs[2 * layer][...]                        # (out, in)
        b = inner_refs[2 * layer + 1][...]                    # (out, 1)
        h = jnp.maximum(
            jnp.dot(w, h, preferred_element_type=jnp.float32) + b, 0.0)

    # Row-sum over the lane (batch) axis into the persistent accumulator.
    # Masking of zero-padded columns only happens on the last tile, and only
    # when padding exists at all (trace-time decision).
    if has_padding:
        @pl.when(i < last)
        def _acc_full():
            acc_ref[...] += jnp.sum(h, axis=1, keepdims=True)

        @pl.when(i == last)
        def _acc_masked():
            col = jax.lax.broadcasted_iota(jnp.int32, (1, tile_n), 1)
            valid = (i * tile_n + col) < n_rows               # (1, tile_n)
            acc_ref[...] += jnp.sum(jnp.where(valid, h, 0.0),
                                    axis=1, keepdims=True)
    else:
        acc_ref[...] += jnp.sum(h, axis=1, keepdims=True)

    # Epilogue on the last tile: mean, optional outer net, fused predictors.
    # Everything stays in column form (h_last, 1) so no in-kernel transpose
    # is needed; the final store is a tiny (P_pad, 1) column written once.
    @pl.when(i == last)
    def _epilogue():
        hbar = acc_ref[...] * jnp.float32(1.0 / n_rows)       # (h_last, 1)
        for layer in range(n_outer):
            w = outer_refs[2 * layer][...]                    # (h, h)
            b = outer_refs[2 * layer + 1][...]                # (h, 1)
            hbar = jnp.maximum(
                jnp.dot(w, hbar, preferred_element_type=jnp.float32) + b, 0.0)
        out_ref[...] = (
            jnp.dot(pw_ref[...], hbar, preferred_element_type=jnp.float32)
            + pb_ref[...])


# ----------------------------------------------------------------------------
# HyperNetwork in JAX (parameter setup is glue; the forward is one Pallas call)
# ----------------------------------------------------------------------------

def _linear_init(key, fan_in: int, fan_out: int) -> Tuple[jnp.ndarray, jnp.ndarray]:
    """Mirror torch.nn.Linear's U(-1/sqrt(in), 1/sqrt(in)) init.

    Returns W with PyTorch (out, in) layout and b as an (out, 1) column.
    """
    kw, kb = jax.random.split(key)
    bound = 1.0 / np.sqrt(fan_in)
    w = jax.random.uniform(kw, (fan_out, fan_in), jnp.float32, -bound, bound)
    b = jax.random.uniform(kb, (fan_out, 1), jnp.float32, -bound, bound)
    return w, b


class HyperNetworkPallas:
    def __init__(
        self,
        input_size: int,
        hidden_sizes: List[int],
        target_named_param_sizes: Dict[str, Tuple[int, ...]],
        use_outer_net: bool = False,
        key=None,
        max_tile_rows: int = 2048,   # rows per grid step (multiple of 128)
    ):
        assert max_tile_rows % 128 == 0
        self.input_size = input_size
        self.hidden_sizes = list(hidden_sizes)
        self.use_outer_net = use_outer_net
        self.target_named_param_sizes = dict(target_named_param_sizes)
        self.h_last = hidden_sizes[-1]
        self.max_tile_rows = max_tile_rows

        key = jax.random.PRNGKey(0) if key is None else key
        n_inner = len(hidden_sizes)
        n_outer = 3 if use_outer_net else 0
        n_pred = len(self.target_named_param_sizes)
        keys = jax.random.split(key, n_inner + n_outer + n_pred)
        ki = 0

        # inner_net: Linear(input_size, h0)+ReLU, then Linear(h_i, h_{i+1})+ReLU
        self.inner_w, self.inner_b = [], []
        sizes = [input_size] + list(hidden_sizes)
        for i in range(n_inner):
            w, b = _linear_init(keys[ki], sizes[i], sizes[i + 1]); ki += 1
            self.inner_w.append(w)
            self.inner_b.append(b)

        # outer_net: 3 x (Linear(h_last, h_last) + ReLU)
        self.outer_w, self.outer_b = [], []
        for _ in range(n_outer):
            w, b = _linear_init(keys[ki], self.h_last, self.h_last); ki += 1
            self.outer_w.append(w)
            self.outer_b.append(b)

        # weight_predictors: one Linear(h_last, prod(param_size)) per target
        # parameter, fused into a single concatenated (out, in) weight.
        pred_ws, pred_bs, self.pred_splits = [], [], []
        for _name, psize in self.target_named_param_sizes.items():
            out_dim = int(np.prod(psize))
            w, b = _linear_init(keys[ki], self.h_last, out_dim); ki += 1
            pred_ws.append(w)
            pred_bs.append(b)
            self.pred_splits.append(out_dim)
        w_cat = jnp.concatenate(pred_ws, axis=0)          # (total_P, h_last)
        b_cat = jnp.concatenate(pred_bs, axis=0)          # (total_P, 1)
        self.total_p = int(w_cat.shape[0])
        self.total_p_pad = _round_up(self.total_p, 8)     # sublane-aligned
        pad = self.total_p_pad - self.total_p
        self.pred_w_cat = w_cat                            # for the reference
        self.pred_b_cat = b_cat
        self.pred_w_pad = jnp.pad(w_cat, ((0, pad), (0, 0)))
        self.pred_b_pad = jnp.pad(b_cat, ((0, pad), (0, 0)))

        # Single jitted forward: transpose/pad, one pallas_call, slice/reshape
        # of the named parameters all inside one XLA computation.
        self._forward_jit = jax.jit(self._forward)

    # ------------------------------------------------------------------ #
    def _forward(self, x: jnp.ndarray) -> Dict[str, jnp.ndarray]:
        x_flat = x.reshape(-1, self.input_size).astype(jnp.float32)
        n_rows = x_flat.shape[0]

        # Balanced row tiling (trace-time): single full-extent tile when it
        # fits, otherwise the smallest balanced 128-multiple tile so the last
        # tile is never mostly padding.
        if n_rows <= self.max_tile_rows:
            tile_n = n_rows
        else:
            n_tiles0 = _cdiv(n_rows, self.max_tile_rows)
            tile_n = min(self.max_tile_rows,
                         _round_up(_cdiv(n_rows, n_tiles0), 128))
        n_tiles = _cdiv(n_rows, tile_n)
        n_pad = n_tiles * tile_n
        has_padding = n_pad != n_rows

        # Present x transposed so the batch axis sits on lanes (lane-dense
        # activations; 16x smaller x VMEM tiles).  One cheap extra pass.
        x_t = x_flat.T                                        # (in, n_rows)
        if has_padding:
            x_t = jnp.pad(x_t, ((0, 0), (0, n_pad - n_rows)))

        n_inner = len(self.inner_w)
        n_outer = len(self.outer_w)

        in_specs = [pl.BlockSpec((self.input_size, tile_n), lambda i: (0, i))]
        args = [x_t]
        for w, b in zip(self.inner_w, self.inner_b):
            in_specs += [pl.BlockSpec(w.shape, lambda i: (0, 0)),
                         pl.BlockSpec(b.shape, lambda i: (0, 0))]
            args += [w, b]
        for w, b in zip(self.outer_w, self.outer_b):
            in_specs += [pl.BlockSpec(w.shape, lambda i: (0, 0)),
                         pl.BlockSpec(b.shape, lambda i: (0, 0))]
            args += [w, b]
        in_specs += [pl.BlockSpec(self.pred_w_pad.shape, lambda i: (0, 0)),
                     pl.BlockSpec(self.pred_b_pad.shape, lambda i: (0, 0))]
        args += [self.pred_w_pad, self.pred_b_pad]

        kernel = functools.partial(
            _fused_hypernet_kernel, n_rows, tile_n, has_padding,
            n_inner, n_outer)

        flat_col = pl.pallas_call(
            kernel,
            out_shape=jax.ShapeDtypeStruct((self.total_p_pad, 1), jnp.float32),
            grid_spec=pltpu.PrefetchScalarGridSpec(
                num_scalar_prefetch=0,
                grid=(n_tiles,),
                in_specs=in_specs,
                out_specs=pl.BlockSpec((self.total_p_pad, 1), lambda i: (0, 0)),
                scratch_shapes=[pltpu.VMEM((self.h_last, 1), jnp.float32)],
            ),
            compiler_params=pltpu.CompilerParams(
                dimension_semantics=("arbitrary",),   # row axis = reduction
                vmem_limit_bytes=32 * 1024 * 1024,    # safe on v7x too
            ),
        )(*args)

        # Split the flat prediction into named parameters (all under jit).
        flat = flat_col[:, 0]
        out: Dict[str, jnp.ndarray] = {}
        off = 0
        for (name, psize), size in zip(
                self.target_named_param_sizes.items(), self.pred_splits):
            out[name] = flat[off: off + size].reshape(psize)
            off += size
        return out

    def __call__(self, x: jnp.ndarray) -> Dict[str, jnp.ndarray]:
        return self._forward_jit(x)

    # ------------------------------------------------------------------ #
    # pure-JAX reference for validation (PyTorch semantics)
    def reference(self, x: jnp.ndarray) -> Dict[str, jnp.ndarray]:
        h = x.reshape(-1, self.input_size).astype(jnp.float32)
        for w, b in zip(self.inner_w, self.inner_b):
            h = jnp.maximum(h @ w.T + b.T, 0.0)
        h = jnp.mean(h, axis=0, keepdims=True)
        for w, b in zip(self.outer_w, self.outer_b):
            h = jnp.maximum(h @ w.T + b.T, 0.0)
        flat = (h @ self.pred_w_cat.T + self.pred_b_cat.T)[0]
        out, off = {}, 0
        for (name, psize), size in zip(
                self.target_named_param_sizes.items(), self.pred_splits):
            out[name] = flat[off: off + size].reshape(psize)
            off += size
        return out


# ----------------------------------------------------------------------------
# Main
# ----------------------------------------------------------------------------

if __name__ == "__main__":
    # Downstream network: small 2-layer MLP -> its named parameter shapes
    # (PyTorch Linear weights are (out, in), biases (out,)).  total_P = 212.
    target_named_param_sizes = {
        "fc1.weight": (16, 8),
        "fc1.bias": (16,),
        "fc2.weight": (4, 16),
        "fc2.bias": (4,),
    }

    input_size = 8
    hidden_sizes = [32, 32]

    key = jax.random.PRNGKey(0)
    k_p1, k_p2, k_x1, k_x2 = jax.random.split(key, 4)

    # Config 1: default module config (use_outer_net=False), small batch
    # (N=16) -> single full-extent tile, no padding, no masking path.
    net = HyperNetworkPallas(
        input_size, hidden_sizes, target_named_param_sizes,
        use_outer_net=False, key=k_p1,
    )
    x = jax.random.normal(k_x1, (4, 4, input_size), dtype=jnp.float32)  # N=16
    params = net(x)
    params = jax.tree_util.tree_map(jax.block_until_ready, params)
    ref = net.reference(x)
    for name, psize in target_named_param_sizes.items():
        assert params[name].shape == tuple(psize)
        np.testing.assert_allclose(
            np.asarray(params[name]), np.asarray(ref[name]),
            rtol=1e-5, atol=1e-5)

    # Config 2: outer net enabled, N=600 with a deliberately small
    # max_tile_rows=256 so the multi-tile grid, cross-tile accumulation and
    # last-tile-only masking of padded columns are exercised with small data.
    net2 = HyperNetworkPallas(
        input_size, hidden_sizes, target_named_param_sizes,
        use_outer_net=True, key=k_p2, max_tile_rows=256,
    )
    x2 = jax.random.normal(k_x2, (600, input_size), dtype=jnp.float32)
    params2 = net2(x2)
    params2 = jax.tree_util.tree_map(jax.block_until_ready, params2)
    ref2 = net2.reference(x2)
    for name, psize in target_named_param_sizes.items():
        assert params2[name].shape == tuple(psize)
        np.testing.assert_allclose(
            np.asarray(params2[name]), np.asarray(ref2[name]),
            rtol=1e-4, atol=1e-5)

    print("KERNEL_OK")
</pallas_src>

<mosaic_0001>
module attributes {stable_mosaic.version = 11 : i64} {
  func.func @_fused_hypernet_kernel(%arg0: i32, %arg1: memref<8x16xf32, #tpu.memory_space<vmem>>, %arg2: memref<32x8xf32, #tpu.memory_space<vmem>>, %arg3: memref<32x1xf32, #tpu.memory_space<vmem>>, %arg4: memref<32x32xf32, #tpu.memory_space<vmem>>, %arg5: memref<32x1xf32, #tpu.memory_space<vmem>>, %arg6: memref<216x32xf32, #tpu.memory_space<vmem>>, %arg7: memref<216x1xf32, #tpu.memory_space<vmem>>, %arg8: memref<216x1xf32, #tpu.memory_space<vmem>>, %arg9: memref<32x1xf32, #tpu.memory_space<vmem>>) attributes {dimension_semantics = [#tpu.dimension_semantics<arbitrary>], iteration_bounds = array<i64: 1>, scalar_prefetch = 0 : i64, scratch_operands = 1 : i64, tpu.core_type = #tpu.core_type<tc>, window_params = [{transform_indices = @transform_0, window_bounds = array<i64: 8, 16>}, {pipeline_mode = #tpu.pipeline_mode<synchronous>, transform_indices = @transform_1, window_bounds = array<i64: 32, 8>}, {pipeline_mode = #tpu.pipeline_mode<synchronous>, transform_indices = @transform_2, window_bounds = array<i64: 32, 1>}, {pipeline_mode = #tpu.pipeline_mode<synchronous>, transform_indices = @transform_3, window_bounds = array<i64: 32, 32>}, {pipeline_mode = #tpu.pipeline_mode<synchronous>, transform_indices = @transform_4, window_bounds = array<i64: 32, 1>}, {pipeline_mode = #tpu.pipeline_mode<synchronous>, transform_indices = @transform_5, window_bounds = array<i64: 216, 32>}, {pipeline_mode = #tpu.pipeline_mode<synchronous>, transform_indices = @transform_6, window_bounds = array<i64: 216, 1>}, {pipeline_mode = #tpu.pipeline_mode<synchronous>, transform_indices = @transform_7, window_bounds = array<i64: 216, 1>}]} {
    %c0_i32 = arith.constant 0 : i32
    %0 = arith.cmpi eq, %arg0, %c0_i32 : i32
    %1 = arith.extui %0 : i1 to i32
    %c0_i32_0 = arith.constant 0 : i32
    %2 = arith.cmpi ne, %1, %c0_i32_0 : i32
    scf.if %2 {
      %cst_20 = arith.constant 0.000000e+00 : f32
      %26 = vector.broadcast %cst_20 : f32 to vector<32x1xf32>
      %c0_21 = arith.constant 0 : index
      %c0_22 = arith.constant 0 : index
      %27 = vector.load %arg9[%c0_21, %c0_22] : memref<32x1xf32, #tpu.memory_space<vmem>>, vector<32x1xf32>
      tpu.vector_store %arg9[%c0_21, %c0_22], %26 {strides = array<i32>} : memref<32x1xf32, #tpu.memory_space<vmem>>, vector<32x1xf32>,
    } else {
    }
    %c0 = arith.constant 0 : index
    %c0_1 = arith.constant 0 : index
    %3 = vector.load %arg1[%c0, %c0_1] : memref<8x16xf32, #tpu.memory_space<vmem>>, vector<8x16xf32>
    %c0_2 = arith.constant 0 : index
    %c0_3 = arith.constant 0 : index
    %4 = vector.load %arg2[%c0_2, %c0_3] : memref<32x8xf32, #tpu.memory_space<vmem>>, vector<32x8xf32>
    %c0_4 = arith.constant 0 : index
    %c0_5 = arith.constant 0 : index
    %5 = vector.load %arg3[%c0_4, %c0_5] : memref<32x1xf32, #tpu.memory_space<vmem>>, vector<32x1xf32>
    %cst = arith.constant dense<0.000000e+00> : vector<32x16xf32>
    %6 = tpu.matmul %4, %3, %cst {dimension_numbers = #tpu.dot_dimension_numbers<[1], [0], [0], [1], [0, 0, 1, 1], [], []>} : vector<32x8xf32>, vector<8x16xf32>, vector<32x16xf32> -> vector<32x16xf32>
    %7 = vector.broadcast %5 : vector<32x1xf32> to vector<32x16xf32>
    %8 = arith.addf %6, %7 : vector<32x16xf32>
    %cst_6 = arith.constant 0.000000e+00 : f32
    %9 = vector.broadcast %cst_6 : f32 to vector<32x16xf32>
    %10 = arith.maximumf %8, %9 : vector<32x16xf32>
    %c0_7 = arith.constant 0 : index
    %c0_8 = arith.constant 0 : index
    %11 = vector.load %arg4[%c0_7, %c0_8] : memref<32x32xf32, #tpu.memory_space<vmem>>, vector<32x32xf32>
    %c0_9 = arith.constant 0 : index
    %c0_10 = arith.constant 0 : index
    %12 = vector.load %arg5[%c0_9, %c0_10] : memref<32x1xf32, #tpu.memory_space<vmem>>, vector<32x1xf32>
    %cst_11 = arith.constant dense<0.000000e+00> : vector<32x16xf32>
    %13 = tpu.matmul %11, %10, %cst_11 {dimension_numbers = #tpu.dot_dimension_numbers<[1], [0], [0], [1], [0, 0, 1, 1], [], []>} : vector<32x32xf32>, vector<32x16xf32>, vector<32x16xf32> -> vector<32x16xf32>
    %14 = vector.broadcast %12 : vector<32x1xf32> to vector<32x16xf32>
    %15 = arith.addf %13, %14 : vector<32x16xf32>
    %cst_12 = arith.constant 0.000000e+00 : f32
    %16 = vector.broadcast %cst_12 : f32 to vector<32x16xf32>
    %17 = arith.maximumf %15, %16 : vector<32x16xf32>
    %c0_13 = arith.constant 0 : index
    %c0_14 = arith.constant 0 : index
    %18 = vector.load %arg9[%c0_13, %c0_14] : memref<32x1xf32, #tpu.memory_space<vmem>>, vector<32x1xf32>
    %cst_15 = arith.constant dense<0.000000e+00> : vector<32xf32>
    %19 = vector.multi_reduction <add>, %17, %cst_15 [1] : vector<32x16xf32> to vector<32xf32>
    %20 = vector.shape_cast %19 : vector<32xf32> to vector<32x1xf32>
    %21 = arith.addf %18, %20 : vector<32x1xf32>
    %c0_16 = arith.constant 0 : index
    %c0_17 = arith.constant 0 : index
    %22 = vector.load %arg9[%c0_16, %c0_17] : memref<32x1xf32, #tpu.memory_space<vmem>>, vector<32x1xf32>
    tpu.vector_store %arg9[%c0_16, %c0_17], %21 {strides = array<i32>} : memref<32x1xf32, #tpu.memory_space<vmem>>, vector<32x1xf32>,
    %c0_i32_18 = arith.constant 0 : i32
    %23 = arith.cmpi eq, %arg0, %c0_i32_18 : i32
    %24 = arith.extui %23 : i1 to i32
    %c0_i32_19 = arith.constant 0 : i32
    %25 = arith.cmpi ne, %24, %c0_i32_19 : i32
    scf.if %25 {
      %c0_20 = arith.constant 0 : index
      %c0_21 = arith.constant 0 : index
      %26 = vector.load %arg9[%c0_20, %c0_21] : memref<32x1xf32, #tpu.memory_space<vmem>>, vector<32x1xf32>
      %cst_22 = arith.constant 6.250000e-02 : f32
      %27 = vector.broadcast %cst_22 : f32 to vector<32x1xf32>
      %28 = arith.mulf %26, %27 : vector<32x1xf32>
      %c0_23 = arith.constant 0 : index
      %c0_24 = arith.constant 0 : index
      %29 = vector.load %arg6[%c0_23, %c0_24] : memref<216x32xf32, #tpu.memory_space<vmem>>, vector<216x32xf32>
      %cst_25 = arith.constant dense<0.000000e+00> : vector<216x1xf32>
      %30 = tpu.matmul %29, %28, %cst_25 {dimension_numbers = #tpu.dot_dimension_numbers<[1], [0], [0], [1], [0, 0, 1, 1], [], []>} : vector<216x32xf32>, vector<32x1xf32>, vector<216x1xf32> -> vector<216x1xf32>
      %c0_26 = arith.constant 0 : index
      %c0_27 = arith.constant 0 : index
      %31 = vector.load %arg7[%c0_26, %c0_27] : memref<216x1xf32, #tpu.memory_space<vmem>>, vector<216x1xf32>
      %32 = arith.addf %30, %31 : vector<216x1xf32>
      %c0_28 = arith.constant 0 : index
      %c0_29 = arith.constant 0 : index
      %33 = vector.load %arg8[%c0_28, %c0_29] : memref<216x1xf32, #tpu.memory_space<vmem>>, vector<216x1xf32>
      tpu.vector_store %arg8[%c0_28, %c0_29], %32 {strides = array<i32>} : memref<216x1xf32, #tpu.memory_space<vmem>>, vector<216x1xf32>,
    } else {
    }
    return
  }
  func.func @transform_0(%arg0: i32) -> (i32, i32) {
    %c0_i32 = arith.constant 0 : i32
    %c0_i32_0 = arith.constant 0 : i32
    return %c0_i32, %arg0 : i32, i32
  }
  func.func @transform_1(%arg0: i32) -> (i32, i32) {
    %c0_i32 = arith.constant 0 : i32
    %c0_i32_0 = arith.constant 0 : i32
    %c0_i32_1 = arith.constant 0 : i32
    return %c0_i32, %c0_i32_0 : i32, i32
  }
  func.func @transform_2(%arg0: i32) -> (i32, i32) {
    %c0_i32 = arith.constant 0 : i32
    %c0_i32_0 = arith.constant 0 : i32
    %c0_i32_1 = arith.constant 0 : i32
    return %c0_i32, %c0_i32_0 : i32, i32
  }
  func.func @transform_3(%arg0: i32) -> (i32, i32) {
    %c0_i32 = arith.constant 0 : i32
    %c0_i32_0 = arith.constant 0 : i32
    %c0_i32_1 = arith.constant 0 : i32
    return %c0_i32, %c0_i32_0 : i32, i32
  }
  func.func @transform_4(%arg0: i32) -> (i32, i32) {
    %c0_i32 = arith.constant 0 : i32
    %c0_i32_0 = arith.constant 0 : i32
    %c0_i32_1 = arith.constant 0 : i32
    return %c0_i32, %c0_i32_0 : i32, i32
  }
  func.func @transform_5(%arg0: i32) -> (i32, i32) {
    %c0_i32 = arith.constant 0 : i32
    %c0_i32_0 = arith.constant 0 : i32
    %c0_i32_1 = arith.constant 0 : i32
    return %c0_i32, %c0_i32_0 : i32, i32
  }
  func.func @transform_6(%arg0: i32) -> (i32, i32) {
    %c0_i32 = arith.constant 0 : i32
    %c0_i32_0 = arith.constant 0 : i32
    %c0_i32_1 = arith.constant 0 : i32
    return %c0_i32, %c0_i32_0 : i32, i32
  }
  func.func @transform_7(%arg0: i32) -> (i32, i32) {
    %c0_i32 = arith.constant 0 : i32
    %c0_i32_0 = arith.constant 0 : i32
    %c0_i32_1 = arith.constant 0 : i32
    return %c0_i32, %c0_i32_0 : i32, i32
  }
}

</mosaic_0001>

<bundles_post_ra>
// kernel: _forward.1
= control target key start
LH: loop header
LB: loop body
LE: loop exit
PB: predicated region body
PF: predicated region fallthrough
CT: control target
= control target key end

     0   :  { %12 = vsyncpa [#allocation4], 0  ;;  %s1475_s0 = inlined_call_operand.vmem [shape: f32[8,16], index: 0, kind: input, shape index: {}]   ;;  %s1476_s1 = inlined_call_operand.hbm [shape: f32[32,8], index: 1, kind: input, shape index: {}]   ;;  %s1477_s2 = inlined_call_operand.hbm [shape: f32[32,1], index: 2, kind: input, shape index: {}]   ;;  %s1478_s3 = inlined_call_operand.hbm [shape: f32[32,32], index: 3, kind: input, shape index: {}]   ;;  %s1479_s4 = inlined_call_operand.vmem [shape: f32[32,1], index: 4, kind: input, shape index: {}]   ;;  %s1480_s5 = inlined_call_operand.hbm [shape: f32[216,32], index: 5, kind: input, shape index: {}]   ;;  %s1481_s6 = inlined_call_operand.hbm [shape: f32[216,1], index: 6, kind: input, shape index: {}]   ;;  %s1482_s7 = inlined_call_operand.vmem [shape: f32[216,1], index: 7, kind: output, shape index: {}]  }
   0x1   :  { %13 = vsyncpa [#allocation6], 0 }
   0x2   :  { %14 = vsyncpa [#allocation9], 0  ;;  %s1107_s24 = smov [#allocation5]   ;;  %s1108_s26 = smov [#allocation8]  }
   0x3   :  { %s34_s25 = sshll.u32 %s1107_s24, 4  ;;  %s60_s27 = sshll.u32 %s1108_s26, 4  ;;  %s35_s25 = int_to_ptr.vmem [resolvable:$true] %s34_s25  ;;  %s1158_s27 = int_to_ptr.vmem [resolvable:$true] %s60_s27 }
   0x4   :  { %s991_s30 = scalar_lea.hbm %s1477_s2, 512 }
   0x5   :  { %p992_p0 = scmp.ne.s32.totalorder %s1477_s2, %s991_s30  ;;  %p995_p1 = scmp.lt.u32.totalorder %s991_s30, %s1477_s2 }
   0x7   :  { %p997_p2 = pnand %p995_p1, %p992_p0 }
   0x9   :  { %1000 = shalt.err (!%p997_p2)
}
   0xa   :  { %s1001_s12 = scalar_lea.vmem %s35_s25, 512  ;;  %p1006_p4 = scmp.lt.s32.totalorder %s35_s25, %s35_s25 }
   0xb   :  { %p1002_p3 = scmp.ne.s32.totalorder %s35_s25, %s1001_s12  ;;  %p1007_p5 = scmp.lt.s32.totalorder %s1001_s12, %s1001_s12 }
   0xd   :  { %p1008_p6 = por %p1007_p5, %p1006_p4 }
   0xf   :  { %p1009_p7 = pnand %p1008_p6, %p1002_p3 }
  0x11   :  { %1012 = shalt.err (!%p1009_p7)
}
  0x12   :  { %s1109_s13 = smov 128   ;;  %s1110_s14 = smov 8  }
  0x13   :  { %40 = dma.hbm_to_vmem [thread:$0]  %s1477_s2, 512, %s35_s25, [#allocation6], %s1109_s13, %s1109_s13, %s1110_s14  }
  0x14   :  { %s1013_s19 = scalar_lea.hbm %s1480_s5, 3456 }
  0x15   :  { %p1014_p8 = scmp.ne.s32.totalorder %s1480_s5, %s1013_s19  ;;  %p1017_p9 = scmp.lt.u32.totalorder %s1013_s19, %s1480_s5 }
  0x17   :  { %p1019_p10 = pnand %p1017_p9, %p1014_p8 }
  0x19   :  { %1022 = shalt.err (!%p1019_p10)
}
  0x1a   :  { %s1023_s24 = scalar_lea.vmem %s1158_s27, 3456  ;;  %p1028_p12 = scmp.lt.s32.totalorder %s1158_s27, %s1158_s27 }
  0x1b   :  { %p1024_p11 = scmp.ne.s32.totalorder %s1158_s27, %s1023_s24  ;;  %p1029_p13 = scmp.lt.s32.totalorder %s1023_s24, %s1023_s24 }
  0x1d   :  { %p1030_p0 = por %p1029_p13, %p1028_p12 }
  0x1f   :  { %p1031_p1 = pnand %p1030_p0, %p1024_p11 }
  0x21   :  { %1034 = shalt.err (!%p1031_p1)
}
  0x22   :  { %66 = dma.hbm_to_vmem [thread:$0]  %s1480_s5, 3456, %s1158_s27, [#allocation9], %s1109_s13, %s1109_s13, %s1110_s14  }
  0x23   :  { %s1111_s26 = smov [#allocation3]   ;;  %s1112_s29 = smov [#allocation7]  }
  0x24   :  { %s22_s28 = sshll.u32 %s1111_s26, 4  ;;  %s46_s30 = sshll.u32 %s1112_s29, 4  ;;  %s23_s28 = int_to_ptr.vmem [resolvable:$true] %s22_s28  ;;  %s1195_s30 = int_to_ptr.vmem [resolvable:$true] %s46_s30 }
  0x25   :  { %s1035_s10 = scalar_lea.hbm %s1476_s1, 512 }
  0x26   :  { %p1036_p2 = scmp.ne.s32.totalorder %s1476_s1, %s1035_s10  ;;  %p1039_p3 = scmp.lt.u32.totalorder %s1035_s10, %s1476_s1 }
  0x28   :  { %p1041_p4 = pnand %p1039_p3, %p1036_p2 }
  0x2a   :  { %1044 = shalt.err (!%p1041_p4)
}
  0x2b   :  { %s1045_s5 = scalar_lea.vmem %s23_s28, 512  ;;  %p1050_p6 = scmp.lt.s32.totalorder %s23_s28, %s23_s28 }
  0x2c   :  { %p1046_p5 = scmp.ne.s32.totalorder %s23_s28, %s1045_s5  ;;  %p1051_p7 = scmp.lt.s32.totalorder %s1045_s5, %s1045_s5 }
  0x2e   :  { %p1052_p8 = por %p1051_p7, %p1050_p6 }
  0x30   :  { %p1053_p9 = pnand %p1052_p8, %p1046_p5 }
  0x32   :  { %1056 = shalt.err (!%p1053_p9)
}
  0x33   :  { %28 = dma.hbm_to_vmem [thread:$0]  %s1476_s1, 512, %s23_s28, [#allocation4], %s1109_s13, %s1109_s13, %s1110_s14  }
  0x34   :  { %s1057_s20 = scalar_lea.hbm %s1478_s3, 512 }
  0x35   :  { %p1058_p10 = scmp.ne.s32.totalorder %s1478_s3, %s1057_s20  ;;  %p1061_p11 = scmp.lt.u32.totalorder %s1057_s20, %s1478_s3 }
  0x37   :  { %p1063_p12 = pnand %p1061_p11, %p1058_p10 }
  0x39   :  { %1066 = shalt.err (!%p1063_p12)
}
  0x3a   :  { %s1067_s2 = scalar_lea.vmem %s1195_s30, 512  ;;  %p1072_p0 = scmp.lt.s32.totalorder %s1195_s30, %s1195_s30 }
  0x3b   :  { %p1068_p13 = scmp.ne.s32.totalorder %s1195_s30, %s1067_s2  ;;  %p1073_p1 = scmp.lt.s32.totalorder %s1067_s2, %s1067_s2 }
  0x3d   :  { %p1074_p2 = por %p1073_p1, %p1072_p0 }
  0x3f   :  { %p1075_p3 = pnand %p1074_p2, %p1068_p13 }
  0x41   :  { %1078 = shalt.err (!%p1075_p3)
}
  0x42   :  { %52 = dma.hbm_to_vmem [thread:$0]  %s1478_s3, 512, %s1195_s30, [#allocation6], %s1109_s13, %s1109_s13, %s1110_s14  }
  0x43   :  { %s1113_s26 = smov [#allocation10]   ;;  %s1079_s9 = scalar_lea.hbm %s1481_s6, 3456 }
  0x44   :  { %s72_s28 = sshll.u32 %s1113_s26, 4  ;;  %p1080_p4 = scmp.ne.s32.totalorder %s1481_s6, %s1079_s9  ;;  %s73_s28 = int_to_ptr.vmem [resolvable:$true] %s72_s28 }
  0x45   :  { %p1083_p5 = scmp.lt.u32.totalorder %s1079_s9, %s1481_s6 }
  0x47   :  { %p1085_p6 = pnand %p1083_p5, %p1080_p4 }
  0x49   :  { %1088 = shalt.err (!%p1085_p6)
}
  0x4a   :  { %s1089_s16 = scalar_lea.vmem %s73_s28, 3456  ;;  %p1094_p8 = scmp.lt.s32.totalorder %s73_s28, %s73_s28 }
  0x4b   :  { %p1090_p7 = scmp.ne.s32.totalorder %s73_s28, %s1089_s16  ;;  %p1095_p9 = scmp.lt.s32.totalorder %s1089_s16, %s1089_s16 }
  0x4d   :  { %p1096_p10 = por %p1095_p9, %p1094_p8 }
  0x4f   :  { %p1097_p11 = pnand %p1096_p10, %p1090_p7 }
  0x51   :  { %1100 = shalt.err (!%p1097_p11)
}
  0x52   :  { %78 = dma.hbm_to_vmem [thread:$0]  %s1481_s6, 3456, %s73_s28, [#allocation9], %s1109_s13, %s1109_s13, %s1110_s14  }
  0x53   :  { %1101 = dma.done.wait [#allocation4], 512  }
  0x54   :  { %1102 = vsyncadd [#allocation4], 4294966784 }
  0x55   :  { %1103 = dma.done.wait [#allocation6], 1024  }
  0x56   :  { %1104 = vsyncadd [#allocation6], 4294966272 }
  0x57   :  { %1105 = dma.done.wait [#allocation9], 6912  }
  0x58   :  { %1106 = vsyncadd [#allocation9], 4294960384  ;;  %v1114_v0 = vmov 0   ;;  %vm132_vm0 = vcmask 64512   ;;  %v103_v1 = vld [vmem:[%s1475_s0] sm:$0xff]  ;;  %v105_v3 = vld [vmem:[#allocation3 + $0x8] sm:$0xff] }
  0x59   :  { %989 = vset.pattern.permute.xlu0 %v1114_v0  ;;  %990 = vset.pattern.permute.xlu1 %v1114_v0  ;;  %v104_v2 = vld [vmem:[#allocation3] sm:$0xff]  ;;  %v106_v4 = vld [vmem:[#allocation3 + $0x10] sm:$0xff]  ;;  %v109_v7 = vld [vmem:[#allocation5 + $0x8] sm:$0xff]  ;;  %vm262_vm1 = vcmask 261120   ;;  %vm98_vm2 = vcmask 7168   ;;  %v1115_v36 = vmov 0.0  }
  0x5a   :  { %849 = vmatprep.subr.mxu1 %v103_v1  ;;  %851 = vmatprep.mubr.msk.f32.mxu1 %vm132_vm0, %v104_v2  ;;  %v108_v5 = vld [vmem:[#allocation5] sm:$0xff]  ;;  %v110_v6 = vld [vmem:[#allocation5 + $0x10] sm:$0xff]  ;;  %v107_v8 = vld [vmem:[#allocation3 + $0x18] sm:$0xff]  ;;  %100 = vst.msk [vmem:[#allocation2 + $0x8] sm:$0xff] %vm98_vm2, %v1115_v36  ;;  %vm368_vm3 = vcmask 130048   ;;  %v1116_v57 = vmov 0.0|0.0  }
  0x5b   :  { %850 = vmatpush3.msra.mxu1 %v103_v1  ;;  %114 = vperm.xlu0 %989, %v108_v5   ;;  %v111_v9 = vld [vmem:[#allocation5 + $0x18] sm:$0xff]  ;;  %v238_v10 = vld [vmem:[%s1479_s4] sm:$0xff]  ;;  %v239_v11 = vld [vmem:[%s1479_s4 + $0x8] sm:$0xff]  ;;  %99 = vst.msk [vmem:[#allocation2] sm:$0xff] %vm98_vm2, %v1115_v36  ;;  %vm1117_vm4 = vmmov 0  }
  0x5c   :  { %852 = vmatmul.mubr.msk.f32.vlgmr.msra.gmra.mrb[0].mxu1 %vm132_vm0, %v105_v3  ;;  %124 = vperm.xlu1 %990, %v110_v6   ;;  %v240_v12 = vld [vmem:[%s1479_s4 + $0x10] sm:$0xff]  ;;  %v241_v13 = vld [vmem:[%s1479_s4 + $0x18] sm:$0xff]  ;;  %v234_v14 = vld [vmem:[#allocation7] sm:$0xff]  ;;  %101 = vst.msk [vmem:[#allocation2 + $0x10] sm:$0xff] %vm98_vm2, %v1115_v36 }
  0x5d   :  { %854 = vmatprep.mubr.msk.f32.mxu1 %vm132_vm0, %v106_v4  ;;  %v235_v33 = vld [vmem:[#allocation7 + $0x8] sm:$0xff]  ;;  %v236_v34 = vld [vmem:[#allocation7 + $0x10] sm:$0xff]  ;;  %v237_v35 = vld [vmem:[#allocation7 + $0x18] sm:$0xff]  ;;  %102 = vst.msk [vmem:[#allocation2 + $0x18] sm:$0xff] %vm98_vm2, %v1115_v36  ;;  %968 = vmatprep.subr.bf16.mxu0 %v1116_v57 }
  0x5e   :  { %879 = vmatprep.mubr.msk.f32.mxu0 %vm1117_vm4, %v1115_v36 }
  0x5f   :  { %119 = vperm.xlu0 %989, %v109_v7  }
  0x60   :  { %855 = vmatmul.mubr.msk.f32.gmra.mrb[2].mxu1 %vm132_vm0, %v107_v8  ;;  %129 = vperm.xlu1 %990, %v111_v9  }
  0x61   :  { %865 = vmatprep.mubr.msk.f32.mxu1 %vm262_vm1, %v234_v14  ;;  %v365_v58 = vld [vmem:[#allocation2 + $0x8] sm:$0xff] }
  0x62   :  { %v364_v59 = vld [vmem:[#allocation2] sm:$0xff] }
  0x63   :  { %244 = vperm.xlu0 %989, %v238_v10   ;;  %v366_v0 = vld [vmem:[#allocation2 + $0x10] sm:$0xff] }
  0x64   :  { %249 = vperm.xlu1 %990, %v239_v11   ;;  %v367_v3 = vld [vmem:[#allocation2 + $0x18] sm:$0xff] }
  0x67   :  { %254 = vperm.xlu0 %989, %v240_v12  }
  0x68   :  { %259 = vperm.xlu1 %990, %v241_v13  }
  0xda   :  { %v115_v15 = vpop.permute.xlu0 %114 }
  0xdb   :  { %v125_v16 = vpop.permute.xlu1 %124 }
  0xde   :  { %v120_v17 = vpop.permute.xlu0 %119 }
  0xdf   :  { %v130_v23 = vpop.permute.xlu1 %129 }
  0xe2   :  { %v245_v37 = vpop.permute.xlu0 %244 }
  0xe3   :  { %v250_v38 = vpop.permute.xlu1 %249 }
  0xe6   :  { %v255_v44 = vpop.permute.xlu0 %254 }
  0xe7   :  { %v260_v47 = vpop.permute.xlu1 %259 }
 0x12f   :  { %v853_v18 = vpop.f32.mrb[0].mxu1 }
 0x130   :  { %v217_v19 = vadd.f32 %v853_v18, %v120_v17  ;;  %v211_v20 = vpop.f32.mrb[1].mxu1  ;;  %v416_v17 = vld [vmem:[#allocation8 + $0x78] sm:$0xff]  ;;  %v402_v18 = vld [vmem:[#allocation8 + $0x8] sm:$0xff] }
 0x131   :  { %v212_v21 = vadd.f32 %v211_v20, %v115_v15  ;;  %v403_v20 = vld [vmem:[#allocation8 + $0x10] sm:$0xff] }
 0x132   :  { %v231_v22 = vmax.f32 %v217_v19, 0.0  ;;  %v417_v19 = vld [vmem:[#allocation8 + $0x80] sm:$0xff] }
 0x133   :  { %v230_v24 = vmax.f32 %v212_v21, 0.0  ;;  %v856_v25 = vpop.f32.mrb[2].mxu1  ;;  %v418_v21 = vld [vmem:[#allocation8 + $0x88] sm:$0xff] }
 0x134   :  { %v227_v26 = vadd.f32 %v856_v25, %v130_v23  ;;  %v221_v27 = vpop.f32.mrb[3].mxu1  ;;  %v419_v23 = vld [vmem:[#allocation8 + $0x90] sm:$0xff]  ;;  %v420_v25 = vld [vmem:[#allocation8 + $0x98] sm:$0xff] }
 0x135   :  { %v960_v28 = vpack.c.bf16 %v231_v22, %v230_v24  ;;  %v222_v29 = vadd.f32 %v221_v27, %v125_v16  ;;  %v401_v16 = vld [vmem:[#allocation8] sm:$0xff]  ;;  %v404_v22 = vld [vmem:[#allocation8 + $0x18] sm:$0xff] }
 0x136   :  { %v233_v30 = vmax.f32 %v227_v26, 0.0  ;;  %v405_v24 = vld [vmem:[#allocation8 + $0x20] sm:$0xff]  ;;  %v406_v26 = vld [vmem:[#allocation8 + $0x28] sm:$0xff] }
 0x137   :  { %v232_v31 = vmax.f32 %v222_v29, 0.0  ;;  %961 = vmatprep.subr.bf16.mxu1 %v960_v28  ;;  %v421_v27 = vld [vmem:[#allocation8 + $0xa0] sm:$0xff]  ;;  %v422_v29 = vld [vmem:[#allocation8 + $0xa8] sm:$0xff] }
 0x138   :  { %963 = vmatpush3.bf16.msra.mxu1 %v960_v28  ;;  %v407_v28 = vld [vmem:[#allocation8 + $0x30] sm:$0xff] }
 0x139   :  { %v964_v32 = vpack.c.bf16 %v233_v30, %v232_v31  ;;  %v408_v30 = vld [vmem:[#allocation8 + $0x38] sm:$0xff]  ;;  %v423_v31 = vld [vmem:[#allocation8 + $0xb0] sm:$0xff] }
 0x13b   :  { %965 = vmatprep.subr.bf16.mxu1 %v964_v32 }
 0x13c   :  { %967 = vmatpush3.bf16.msra.mxu1 %v964_v32  ;;  %v409_v32 = vld [vmem:[#allocation8 + $0x40] sm:$0xff] }
 0x13d   :  { %974 = vmatprep.subr.bf16.mxu1 %v1116_v57 }
 0x13f   :  { %866 = vmatmul.mubr.msk.f32.vlgmr.msra.gmra.mrb[4].mxu1 %vm262_vm1, %v235_v33  ;;  %v424_v33 = vld [vmem:[#allocation8 + $0xb8] sm:$0xff] }
 0x140   :  { %868 = vmatprep.mubr.msk.f32.mxu1 %vm262_vm1, %v236_v34  ;;  %v410_v34 = vld [vmem:[#allocation8 + $0x48] sm:$0xff] }
 0x143   :  { %869 = vmatmul.mubr.msk.f32.gmra.mrb[6].mxu1 %vm262_vm1, %v237_v35  ;;  %v425_v35 = vld [vmem:[#allocation8 + $0xc0] sm:$0xff] }
 0x144   :  { %924 = vmatprep.mubr.msk.f32.mxu1 %vm1117_vm4, %v1115_v36 }
 0x212   :  { %v867_v39 = vpop.f32.mrb[4].mxu1 }
 0x213   :  { %v347_v40 = vadd.f32 %v867_v39, %v250_v38  ;;  %v341_v41 = vpop.f32.mrb[5].mxu1  ;;  %v426_v38 = vld [vmem:[#allocation8 + $0xc8] sm:$0xff]  ;;  %v412_v39 = vld [vmem:[#allocation8 + $0x58] sm:$0xff] }
 0x214   :  { %v342_v42 = vadd.f32 %v341_v41, %v245_v37  ;;  %v411_v37 = vld [vmem:[#allocation8 + $0x50] sm:$0xff]  ;;  %v413_v41 = vld [vmem:[#allocation8 + $0x60] sm:$0xff] }
 0x215   :  { %v361_v43 = vmax.f32 %v347_v40, 0.0  ;;  %v427_v40 = vld [vmem:[#allocation8 + $0xd0] sm:$0xff] }
 0x216   :  { %v360_v45 = vmax.f32 %v342_v42, 0.0  ;;  %v870_v46 = vpop.f32.mrb[6].mxu1  ;;  %v414_v42 = vld [vmem:[#allocation8 + $0x68] sm:$0xff] }
 0x217   :  { %v351_v48 = vpop.f32.mrb[7].mxu1  ;;  %v372_v49 = vsel %vm368_vm3, %v361_v43, 0.0  ;;  %v357_v50 = vadd.f32 %v870_v46, %v260_v47  ;;  %v415_v43 = vld [vmem:[#allocation8 + $0x70] sm:$0xff] }
 0x218   :  { %v352_v51 = vadd.f32 %v351_v48, %v255_v44  ;;  %373 = vadd.xlane.f32.xlu1 %v372_v49  ;;  %v369_v52 = vsel %vm368_vm3, %v360_v45, 0.0  ;;  %v428_v44 = vld [vmem:[#allocation10] sm:$0xff]  ;;  %v443_v45 = vld [vmem:[#allocation10 + $0x78] sm:$0xff] }
 0x219   :  { %370 = vadd.xlane.f32.xlu0 %v369_v52  ;;  %v363_v54 = vmax.f32 %v357_v50, 0.0  ;;  %v429_v52 = vld [vmem:[#allocation10 + $0x8] sm:$0xff] }
 0x21a   :  { %v362_v53 = vmax.f32 %v352_v51, 0.0 }
 0x21b   :  { %v378_v56 = vsel %vm368_vm3, %v363_v54, 0.0 }
 0x21c   :  { %v375_v55 = vsel %vm368_vm3, %v362_v53, 0.0  ;;  %v444_v53 = vld [vmem:[#allocation10 + $0x80] sm:$0xff] }
 0x21d   :  { %376 = vadd.xlane.f32.xlu0 %v375_v55 }
 0x221   :  { %379 = vadd.xlane.f32.xlu0 %v378_v56 }
 0x2a5   :  { %v374_v60 = vpop.xlane.xlu1 %373 }
 0x2a6   :  { %v382_v61 = vadd.f32 %v374_v60, %v365_v58  ;;  %v371_v62 = vpop.xlane.xlu0 %370  ;;  %v445_v60 = vld [vmem:[#allocation10 + $0x88] sm:$0xff] }
 0x2a7   :  { %v381_v63 = vadd.f32 %v371_v62, %v364_v59  ;;  %v430_v59 = vld [vmem:[#allocation10 + $0x10] sm:$0xff] }
 0x2a8   :  { %387 = vst.msk [vmem:[#allocation2 + $0x8] sm:$0xff] %vm98_vm2, %v382_v61 }
 0x2a9   :  { %386 = vst.msk [vmem:[#allocation2] sm:$0xff] %vm98_vm2, %v381_v63 }
 0x2aa   :  { %v377_v1 = vpop.xlane.xlu0 %376 }
 0x2ab   :  { %v383_v2 = vadd.f32 %v377_v1, %v366_v0 }
 0x2ad   :  { %388 = vst.msk [vmem:[#allocation2 + $0x10] sm:$0xff] %vm98_vm2, %v383_v2 }
 0x2ae   :  { %v380_v4 = vpop.xlane.xlu0 %379 }
 0x2af   :  { %v384_v5 = vadd.f32 %v380_v4, %v367_v3  ;;  %v394_v6 = vld [vmem:[#allocation2 + $0x8] sm:$0xff]  ;;  %v431_v3 = vld [vmem:[#allocation10 + $0x18] sm:$0xff] }
 0x2b0   :  { %v393_v7 = vld [vmem:[#allocation2] sm:$0xff]  ;;  %v398_v8 = vmul.f32 0.0625, %v394_v6  ;;  %v446_v4 = vld [vmem:[#allocation10 + $0x90] sm:$0xff] }
 0x2b1   :  { %389 = vst.msk [vmem:[#allocation2 + $0x18] sm:$0xff] %vm98_vm2, %v384_v5  ;;  %v397_v9 = vmul.f32 0.0625, %v393_v7 }
 0x2b3   :  { %v969_v10 = vpack.c.bf16 %v398_v8, %v397_v9 }
 0x2b4   :  { %v395_v11 = vld [vmem:[#allocation2 + $0x10] sm:$0xff] }
 0x2b5   :  { %970 = vmatpush3.bf16.msra.mxu0 %v969_v10  ;;  %976 = vmatpush3.bf16.msra.mxu1 %v969_v10  ;;  %v399_v13 = vmul.f32 0.0625, %v395_v11  ;;  %v432_v11 = vld [vmem:[#allocation10 + $0x20] sm:$0xff] }
 0x2b6   :  { %971 = vmatprep.subr.bf16.mxu0 %v1116_v57  ;;  %975 = vmatprep.subr.bf16.mxu1 %v1116_v57 }
 0x2b8   :  { %v396_v12 = vld [vmem:[#allocation2 + $0x18] sm:$0xff] }
 0x2b9   :  { %v400_v14 = vmul.f32 0.0625, %v396_v12  ;;  %v447_v12 = vld [vmem:[#allocation10 + $0x98] sm:$0xff] }
 0x2bb   :  { %v972_v15 = vpack.c.bf16 %v400_v14, %v399_v13 }
 0x2bd   :  { %973 = vmatpush3.bf16.msra.mxu0 %v972_v15  ;;  %977 = vmatpush3.bf16.msra.mxu1 %v972_v15 }
 0x2c0   :  { %880 = vmatmul.mubr.msk.f32.vlgmr.msra.gmra.mrb[0].mxu0 %vm262_vm1, %v401_v16  ;;  %925 = vmatmul.mubr.msk.f32.vlgmr.msra.gmra.mrb[8].mxu1 %vm262_vm1, %v416_v17 }
 0x2c1   :  { %882 = vmatprep.mubr.msk.f32.mxu0 %vm1117_vm4, %v1115_v36  ;;  %927 = vmatprep.mubr.msk.f32.mxu1 %vm1117_vm4, %v1115_v36 }
 0x2c4   :  { %883 = vmatmul.mubr.msk.f32.gmra.mrb[2].mxu0 %vm262_vm1, %v402_v18  ;;  %928 = vmatmul.mubr.msk.f32.gmra.mrb[10].mxu1 %vm262_vm1, %v417_v19  ;;  %v433_v19 = vld [vmem:[#allocation10 + $0x28] sm:$0xff] }
 0x2c5   :  { %885 = vmatprep.mubr.msk.f32.mxu0 %vm1117_vm4, %v1115_v36  ;;  %930 = vmatprep.mubr.msk.f32.mxu1 %vm1117_vm4, %v1115_v36 }
 0x2c8   :  { %886 = vmatmul.mubr.msk.f32.gmra.mrb[4].mxu0 %vm262_vm1, %v403_v20  ;;  %931 = vmatmul.mubr.msk.f32.gmra.mrb[12].mxu1 %vm262_vm1, %v418_v21  ;;  %v448_v20 = vld [vmem:[#allocation10 + $0xa0] sm:$0xff] }
 0x2c9   :  { %888 = vmatprep.mubr.msk.f32.mxu0 %vm1117_vm4, %v1115_v36  ;;  %933 = vmatprep.mubr.msk.f32.mxu1 %vm1117_vm4, %v1115_v36 }
 0x2cc   :  { %889 = vmatmul.mubr.msk.f32.gmra.mrb[6].mxu0 %vm262_vm1, %v404_v22  ;;  %934 = vmatmul.mubr.msk.f32.gmra.mrb[14].mxu1 %vm262_vm1, %v419_v23 }
 0x2cd   :  { %891 = vmatprep.mubr.msk.f32.mxu0 %vm1117_vm4, %v1115_v36  ;;  %936 = vmatprep.mubr.msk.f32.mxu1 %vm1117_vm4, %v1115_v36 }
 0x2d0   :  { %892 = vmatmul.mubr.msk.f32.gmra.mrb[8].mxu0 %vm262_vm1, %v405_v24  ;;  %937 = vmatmul.mubr.msk.f32.gmra.mrb[16].mxu1 %vm262_vm1, %v420_v25 }
 0x2d1   :  { %894 = vmatprep.mubr.msk.f32.mxu0 %vm1117_vm4, %v1115_v36  ;;  %939 = vmatprep.mubr.msk.f32.mxu1 %vm1117_vm4, %v1115_v36 }
 0x2d4   :  { %895 = vmatmul.mubr.msk.f32.gmra.mrb[10].mxu0 %vm262_vm1, %v406_v26  ;;  %940 = vmatmul.mubr.msk.f32.gmra.mrb[18].mxu1 %vm262_vm1, %v421_v27  ;;  %v434_v27 = vld [vmem:[#allocation10 + $0x30] sm:$0xff] }
 0x2d5   :  { %897 = vmatprep.mubr.msk.f32.mxu0 %vm1117_vm4, %v1115_v36  ;;  %942 = vmatprep.mubr.msk.f32.mxu1 %vm1117_vm4, %v1115_v36 }
 0x2d8   :  { %898 = vmatmul.mubr.msk.f32.gmra.mrb[12].mxu0 %vm262_vm1, %v407_v28  ;;  %943 = vmatmul.mubr.msk.f32.gmra.mrb[20].mxu1 %vm262_vm1, %v422_v29  ;;  %v449_v28 = vld [vmem:[#allocation10 + $0xa8] sm:$0xff] }
 0x2d9   :  { %900 = vmatprep.mubr.msk.f32.mxu0 %vm1117_vm4, %v1115_v36  ;;  %945 = vmatprep.mubr.msk.f32.mxu1 %vm1117_vm4, %v1115_v36 }
 0x2dc   :  { %901 = vmatmul.mubr.msk.f32.gmra.mrb[14].mxu0 %vm262_vm1, %v408_v30  ;;  %946 = vmatmul.mubr.msk.f32.gmra.mrb[22].mxu1 %vm262_vm1, %v423_v31 }
 0x2dd   :  { %903 = vmatprep.mubr.msk.f32.mxu0 %vm1117_vm4, %v1115_v36  ;;  %948 = vmatprep.mubr.msk.f32.mxu1 %vm1117_vm4, %v1115_v36 }
 0x2e0   :  { %904 = vmatmul.mubr.msk.f32.gmra.mrb[16].mxu0 %vm262_vm1, %v409_v32  ;;  %949 = vmatmul.mubr.msk.f32.gmra.mrb[24].mxu1 %vm262_vm1, %v424_v33 }
 0x2e1   :  { %906 = vmatprep.mubr.msk.f32.mxu0 %vm1117_vm4, %v1115_v36  ;;  %951 = vmatprep.mubr.msk.f32.mxu1 %vm1117_vm4, %v1115_v36 }
 0x2e4   :  { %907 = vmatmul.mubr.msk.f32.gmra.mrb[18].mxu0 %vm262_vm1, %v410_v34  ;;  %952 = vmatmul.mubr.msk.f32.gmra.mrb[26].mxu1 %vm262_vm1, %v425_v35  ;;  %v435_v35 = vld [vmem:[#allocation10 + $0x38] sm:$0xff] }
 0x2e5   :  { %909 = vmatprep.mubr.msk.f32.mxu0 %vm1117_vm4, %v1115_v36  ;;  %954 = vmatprep.mubr.msk.f32.mxu1 %vm1117_vm4, %v1115_v36 }
 0x2e8   :  { %910 = vmatmul.mubr.msk.f32.gmra.mrb[20].mxu0 %vm262_vm1, %v411_v37  ;;  %955 = vmatmul.mubr.msk.f32.gmra.mrb[28].mxu1 %vm262_vm1, %v426_v38  ;;  %v450_v37 = vld [vmem:[#allocation10 + $0xb0] sm:$0xff] }
 0x2e9   :  { %912 = vmatprep.mubr.msk.f32.mxu0 %vm1117_vm4, %v1115_v36  ;;  %957 = vmatprep.mubr.msk.f32.mxu1 %vm1117_vm4, %v1115_v36 }
 0x2ec   :  { %913 = vmatmul.mubr.msk.f32.gmra.mrb[22].mxu0 %vm262_vm1, %v412_v39  ;;  %958 = vmatmul.mubr.msk.f32.gmra.mrb[30].mxu1 %vm262_vm1, %v427_v40 }
 0x2ed   :  { %915 = vmatprep.mubr.msk.f32.mxu0 %vm1117_vm4, %v1115_v36 }
 0x2f0   :  { %916 = vmatmul.mubr.msk.f32.gmra.mrb[24].mxu0 %vm262_vm1, %v413_v41 }
 0x2f1   :  { %918 = vmatprep.mubr.msk.f32.mxu0 %vm1117_vm4, %v1115_v36 }
 0x2f4   :  { %919 = vmatmul.mubr.msk.f32.gmra.mrb[26].mxu0 %vm262_vm1, %v414_v42 }
 0x2f5   :  { %921 = vmatprep.mubr.msk.f32.mxu0 %vm1117_vm4, %v1115_v36 }
 0x2f8   :  { %922 = vmatmul.mubr.msk.f32.gmra.mrb[28].mxu0 %vm262_vm1, %v415_v43 }
 0x393   :  { %v602_v46 = vpop.f32.mrb[0].mxu0  ;;  %v677_v47 = vpop.f32.mrb[8].mxu1 }
 0x394   :  { %v603_v48 = vadd.f32 %v602_v46, %v428_v44  ;;  %v881_v49 = vpop.f32.mrb[1].mxu0  ;;  %v678_v50 = vadd.f32 %v677_v47, %v443_v45  ;;  %v926_v51 = vpop.f32.mrb[9].mxu1  ;;  %v436_v44 = vld [vmem:[#allocation10 + $0x40] sm:$0xff]  ;;  %v451_v45 = vld [vmem:[#allocation10 + $0xb8] sm:$0xff] }
 0x396   :  { %736 = vst.msk [vmem:[%s1482_s7] sm:$0xff] %vm98_vm2, %v603_v48  ;;  %751 = vst.msk [vmem:[%s1482_s7 + $0x78] sm:$0xff] %vm98_vm2, %v678_v50 }
 0x397   :  { %v607_v36 = vpop.f32.mrb[2].mxu0  ;;  %v682_v54 = vpop.f32.mrb[10].mxu1 }
 0x398   :  { %v608_v55 = vadd.f32 %v607_v36, %v429_v52  ;;  %v884_v56 = vpop.f32.mrb[3].mxu0  ;;  %v683_v57 = vadd.f32 %v682_v54, %v444_v53  ;;  %v929_v58 = vpop.f32.mrb[11].mxu1  ;;  %v437_v52 = vld [vmem:[#allocation10 + $0x48] sm:$0xff]  ;;  %v452_v53 = vld [vmem:[#allocation10 + $0xc0] sm:$0xff] }
 0x39a   :  { %737 = vst.msk [vmem:[%s1482_s7 + $0x8] sm:$0xff] %vm98_vm2, %v608_v55  ;;  %752 = vst.msk [vmem:[%s1482_s7 + $0x80] sm:$0xff] %vm98_vm2, %v683_v57 }
 0x39b   :  { %v612_v61 = vpop.f32.mrb[4].mxu0  ;;  %v687_v62 = vpop.f32.mrb[12].mxu1 }
 0x39c   :  { %v613_v63 = vadd.f32 %v612_v61, %v430_v59  ;;  %v887_v0 = vpop.f32.mrb[5].mxu0  ;;  %v688_v1 = vadd.f32 %v687_v62, %v445_v60  ;;  %v932_v2 = vpop.f32.mrb[13].mxu1  ;;  %v438_v59 = vld [vmem:[#allocation10 + $0x50] sm:$0xff]  ;;  %v453_v60 = vld [vmem:[#allocation10 + $0xc8] sm:$0xff] }
 0x39e   :  { %738 = vst.msk [vmem:[%s1482_s7 + $0x10] sm:$0xff] %vm98_vm2, %v613_v63  ;;  %753 = vst.msk [vmem:[%s1482_s7 + $0x88] sm:$0xff] %vm98_vm2, %v688_v1 }
 0x39f   :  { %v617_v5 = vpop.f32.mrb[6].mxu0  ;;  %v692_v6 = vpop.f32.mrb[14].mxu1 }
 0x3a0   :  { %v618_v7 = vadd.f32 %v617_v5, %v431_v3  ;;  %v890_v8 = vpop.f32.mrb[7].mxu0  ;;  %v693_v9 = vadd.f32 %v692_v6, %v446_v4  ;;  %v935_v10 = vpop.f32.mrb[15].mxu1  ;;  %v439_v3 = vld [vmem:[#allocation10 + $0x58] sm:$0xff]  ;;  %v454_v4 = vld [vmem:[#allocation10 + $0xd0] sm:$0xff] }
 0x3a2   :  { %739 = vst.msk [vmem:[%s1482_s7 + $0x18] sm:$0xff] %vm98_vm2, %v618_v7  ;;  %754 = vst.msk [vmem:[%s1482_s7 + $0x90] sm:$0xff] %vm98_vm2, %v693_v9 }
 0x3a3   :  { %v622_v13 = vpop.f32.mrb[8].mxu0  ;;  %v697_v14 = vpop.f32.mrb[16].mxu1 }
 0x3a4   :  { %v623_v15 = vadd.f32 %v622_v13, %v432_v11  ;;  %v893_v16 = vpop.f32.mrb[9].mxu0  ;;  %v698_v17 = vadd.f32 %v697_v14, %v447_v12  ;;  %v938_v18 = vpop.f32.mrb[17].mxu1  ;;  %v440_v11 = vld [vmem:[#allocation10 + $0x60] sm:$0xff] }
 0x3a6   :  { %740 = vst.msk [vmem:[%s1482_s7 + $0x20] sm:$0xff] %vm98_vm2, %v623_v15  ;;  %755 = vst.msk [vmem:[%s1482_s7 + $0x98] sm:$0xff] %vm98_vm2, %v698_v17  ;;  %v441_v15 = vld [vmem:[#allocation10 + $0x68] sm:$0xff] }
 0x3a7   :  { %v627_v21 = vpop.f32.mrb[10].mxu0  ;;  %v702_v22 = vpop.f32.mrb[18].mxu1 }
 0x3a8   :  { %v628_v23 = vadd.f32 %v627_v21, %v433_v19  ;;  %v896_v24 = vpop.f32.mrb[11].mxu0  ;;  %v703_v25 = vadd.f32 %v702_v22, %v448_v20  ;;  %v941_v26 = vpop.f32.mrb[19].mxu1  ;;  %v442_v19 = vld [vmem:[#allocation10 + $0x70] sm:$0xff] }
 0x3aa   :  { %741 = vst.msk [vmem:[%s1482_s7 + $0x28] sm:$0xff] %vm98_vm2, %v628_v23  ;;  %756 = vst.msk [vmem:[%s1482_s7 + $0xa0] sm:$0xff] %vm98_vm2, %v703_v25 }
 0x3ab   :  { %v632_v29 = vpop.f32.mrb[12].mxu0  ;;  %v707_v30 = vpop.f32.mrb[20].mxu1 }
 0x3ac   :  { %v633_v31 = vadd.f32 %v632_v29, %v434_v27  ;;  %v899_v32 = vpop.f32.mrb[13].mxu0  ;;  %v708_v33 = vadd.f32 %v707_v30, %v449_v28  ;;  %v944_v34 = vpop.f32.mrb[21].mxu1 }
 0x3ae   :  { %742 = vst.msk [vmem:[%s1482_s7 + $0x30] sm:$0xff] %vm98_vm2, %v633_v31  ;;  %757 = vst.msk [vmem:[%s1482_s7 + $0xa8] sm:$0xff] %vm98_vm2, %v708_v33 }
 0x3af   :  { %v637_v38 = vpop.f32.mrb[14].mxu0  ;;  %v712_v39 = vpop.f32.mrb[22].mxu1 }
 0x3b0   :  { %v638_v40 = vadd.f32 %v637_v38, %v435_v35  ;;  %v902_v41 = vpop.f32.mrb[15].mxu0  ;;  %v713_v42 = vadd.f32 %v712_v39, %v450_v37  ;;  %v947_v43 = vpop.f32.mrb[23].mxu1 }
 0x3b2   :  { %743 = vst.msk [vmem:[%s1482_s7 + $0x38] sm:$0xff] %vm98_vm2, %v638_v40  ;;  %758 = vst.msk [vmem:[%s1482_s7 + $0xb0] sm:$0xff] %vm98_vm2, %v713_v42 }
 0x3b3   :  { %v642_v46 = vpop.f32.mrb[16].mxu0  ;;  %v717_v47 = vpop.f32.mrb[24].mxu1 }
 0x3b4   :  { %v643_v48 = vadd.f32 %v642_v46, %v436_v44  ;;  %v905_v49 = vpop.f32.mrb[17].mxu0  ;;  %v718_v50 = vadd.f32 %v717_v47, %v451_v45  ;;  %v950_v51 = vpop.f32.mrb[25].mxu1 }
 0x3b6   :  { %744 = vst.msk [vmem:[%s1482_s7 + $0x40] sm:$0xff] %vm98_vm2, %v643_v48  ;;  %759 = vst.msk [vmem:[%s1482_s7 + $0xb8] sm:$0xff] %vm98_vm2, %v718_v50 }
 0x3b7   :  { %v647_v36 = vpop.f32.mrb[18].mxu0  ;;  %v722_v54 = vpop.f32.mrb[26].mxu1 }
 0x3b8   :  { %v648_v55 = vadd.f32 %v647_v36, %v437_v52  ;;  %v908_v56 = vpop.f32.mrb[19].mxu0  ;;  %v723_v57 = vadd.f32 %v722_v54, %v452_v53  ;;  %v953_v58 = vpop.f32.mrb[27].mxu1 }
 0x3ba   :  { %745 = vst.msk [vmem:[%s1482_s7 + $0x48] sm:$0xff] %vm98_vm2, %v648_v55  ;;  %760 = vst.msk [vmem:[%s1482_s7 + $0xc0] sm:$0xff] %vm98_vm2, %v723_v57 }
 0x3bb   :  { %v652_v61 = vpop.f32.mrb[20].mxu0  ;;  %v727_v62 = vpop.f32.mrb[28].mxu1 }
 0x3bc   :  { %v653_v63 = vadd.f32 %v652_v61, %v438_v59  ;;  %v911_v0 = vpop.f32.mrb[21].mxu0  ;;  %v728_v1 = vadd.f32 %v727_v62, %v453_v60  ;;  %v956_v2 = vpop.f32.mrb[29].mxu1 }
 0x3be   :  { %746 = vst.msk [vmem:[%s1482_s7 + $0x50] sm:$0xff] %vm98_vm2, %v653_v63  ;;  %761 = vst.msk [vmem:[%s1482_s7 + $0xc8] sm:$0xff] %vm98_vm2, %v728_v1 }
 0x3bf   :  { %v657_v5 = vpop.f32.mrb[22].mxu0  ;;  %v732_v6 = vpop.f32.mrb[30].mxu1 }
 0x3c0   :  { %v658_v7 = vadd.f32 %v657_v5, %v439_v3  ;;  %v914_v8 = vpop.f32.mrb[23].mxu0  ;;  %v733_v9 = vadd.f32 %v732_v6, %v454_v4  ;;  %v959_v10 = vpop.f32.mrb[31].mxu1 }
 0x3c2   :  { %747 = vst.msk [vmem:[%s1482_s7 + $0x58] sm:$0xff] %vm98_vm2, %v658_v7  ;;  %762 = vst.msk [vmem:[%s1482_s7 + $0xd0] sm:$0xff] %vm98_vm2, %v733_v9 }
 0x3c3   :  { %v662_v12 = vpop.f32.mrb[24].mxu0 }
 0x3c4   :  { %v663_v13 = vadd.f32 %v662_v12, %v440_v11  ;;  %v917_v14 = vpop.f32.mrb[25].mxu0 }
 0x3c6   :  { %748 = vst.msk [vmem:[%s1482_s7 + $0x60] sm:$0xff] %vm98_vm2, %v663_v13 }
 0x3c7   :  { %v667_v16 = vpop.f32.mrb[26].mxu0 }
 0x3c8   :  { %v668_v17 = vadd.f32 %v667_v16, %v441_v15  ;;  %v920_v18 = vpop.f32.mrb[27].mxu0 }
 0x3ca   :  { %749 = vst.msk [vmem:[%s1482_s7 + $0x68] sm:$0xff] %vm98_vm2, %v668_v17 }
 0x3cb   :  { %v672_v20 = vpop.f32.mrb[28].mxu0 }
 0x3cc   :  { %v673_v21 = vadd.f32 %v672_v20, %v442_v19  ;;  %v923_v22 = vpop.f32.mrb[29].mxu0 }
 0x3ce   :  { %750 = vst.msk [vmem:[%s1482_s7 + $0x70] sm:$0xff] %vm98_vm2, %v673_v21 }
 0x3cf   :  { %767 = vsyncpa [#allocation4], 1 }
 0x3d0   :  { %768 = vsyncpa [#allocation6], 1 }
 0x3d1   :  { %769 = vsyncpa [#allocation9], 1 }

</bundles_post_ra>
